<compile_context>
chip_gen: v6e
topology: v6e:2x2x1
jax: 0.10.0
libtpu: 0.0.40
codegen_flags: <defaults>
</compile_context>

<pallas_src>
import jax
import jax.numpy as jnp
from jax.experimental import pallas as pl
from jax.experimental.pallas import tpu as pltpu


def _round_up(v, m):
    return ((v + m - 1) // m) * m


def _sublane_align(dtype):
    # Sub-32-bit dtypes pack along sublanes: 8 rows (f32), 16 (bf16), 32 (int8/fp8).
    return max(8, 32 // jnp.dtype(dtype).itemsize)


def _pick_block(dim, align, cap):
    """Aligned block size, never exceeding `cap` (cap snapped down to `align`).
    Edge blocks are handled by a cdiv grid + Pallas masking, so the block size
    never has to divide `dim` and never falls back to the full dimension."""
    cap = max(align, cap - (cap % align))
    if dim <= cap:
        return _round_up(dim, align)      # single (possibly padded) block
    return cap


def _apply_gate_kernel(x_ref, s_ref, o_ref):
    # x_ref: (BR, BL) tile of flattened activations (rows = batch*channel)
    # s_ref: (BR, 1)  per-row sigmoid gate, broadcast along the lane dim
    x = x_ref[...]
    s = s_ref[...]
    o_ref[...] = jnp.maximum(x * s, 0).astype(o_ref.dtype)


def cca_forward(g, x, w_x, b_x, w_g, b_g, *,
                max_block_rows=256, max_block_lanes=2048, donate_x=False):
    """g: (B, F_g, Hg, Wg), x: (B, F_x, H, W) -> (B, F_x, H, W)."""
    B, Cx, H, W = x.shape
    Bg = g.shape[0]
    assert B == Bg

    # ---------- gate stage (tiny): plain XLA ----------
    # dtype= keeps the f32 convert fused into the reduction (no f32 copy of x).
    avg_x = jnp.mean(x, axis=(2, 3), dtype=jnp.float32)             # (B, Cx)
    avg_g = jnp.mean(g, axis=(2, 3), dtype=jnp.float32)             # (B, Cg)
    att = (avg_x @ w_x.astype(jnp.float32).T + b_x.astype(jnp.float32)
           + avg_g @ w_g.astype(jnp.float32).T + b_g.astype(jnp.float32)) * 0.5
    scale = jax.nn.sigmoid(att).astype(x.dtype)                      # (B, Cx)

    # ---------- apply stage: streaming Pallas kernel ----------
    R = B * Cx
    L = H * W
    x2 = x.reshape(R, L)            # contiguous -> metadata-only reshape
    s2 = scale.reshape(R, 1)

    r_align = _sublane_align(x.dtype)
    BR = _pick_block(R, r_align, max_block_rows)
    BL = _pick_block(L, 128, max_block_lanes)
    grid_r = pl.cdiv(R, BR)
    grid_l = pl.cdiv(L, BL)

    # Guarantee >=2 grid blocks along one parallel axis (v7x megacore sharding).
    if grid_r == 1 and grid_l == 1:
        if BL >= 2 * 128:
            BL = _round_up(pl.cdiv(BL, 2), 128)
            grid_l = pl.cdiv(L, BL)
        elif BR >= 2 * r_align:
            BR = _round_up(pl.cdiv(BR, 2), r_align)
            grid_r = pl.cdiv(R, BR)

    grid = (grid_r, grid_l)
    itemsize = jnp.dtype(x.dtype).itemsize

    # Scoped-VMEM budget: x + out tiles double-buffered, plus the (BR,1) gate
    # tile (padded to a full lane) double-buffered, plus headroom.
    tile_bytes = BR * BL * itemsize
    scale_bytes = BR * 128 * itemsize
    vmem_limit = int(max(4 * tile_bytes + 2 * scale_bytes + (1 << 20), 16 << 20))

    kwargs = {}
    if donate_x:
        kwargs["input_output_aliases"] = {0: 0}   # x2 -> out2 (same shape/dtype)

    out2 = pl.pallas_call(
        _apply_gate_kernel,
        out_shape=jax.ShapeDtypeStruct((R, L), x.dtype),
        grid=grid,
        in_specs=[
            pl.BlockSpec((BR, BL), lambda i, j: (i, j)),
            pl.BlockSpec((BR, 1), lambda i, j: (i, 0)),
        ],
        out_specs=pl.BlockSpec((BR, BL), lambda i, j: (i, j)),
        compiler_params=pltpu.CompilerParams(
            dimension_semantics=("parallel", "parallel"),
            vmem_limit_bytes=vmem_limit),
        cost_estimate=pl.CostEstimate(
            flops=2 * R * L,
            transcendentals=0,
            bytes_accessed=2 * R * L * itemsize + R * itemsize,
        ),
        **kwargs,
    )(x2, s2)

    return out2.reshape(B, Cx, H, W)


def cca_reference(g, x, w_x, b_x, w_g, b_g):
    """Pure-JAX reference mirroring the PyTorch forward."""
    avg_x = jnp.mean(x, axis=(2, 3))                    # (B, F_x)
    avg_g = jnp.mean(g, axis=(2, 3))                    # (B, F_g)
    att_x = avg_x @ w_x.T + b_x
    att_g = avg_g @ w_g.T + b_g
    scale = jax.nn.sigmoid((att_x + att_g) / 2.0)
    out = x * scale[:, :, None, None]
    return jnp.maximum(out, 0.0)


def _make_case(key, B, F_g, F_x, H, W):
    kg, kx, kwx, kbx, kwg, kbg = jax.random.split(key, 6)
    g = jax.random.normal(kg, (B, F_g, H, W), dtype=jnp.float32)
    x = jax.random.normal(kx, (B, F_x, H, W), dtype=jnp.float32)
    # nn.Linear(F_x, F_x): weight (F_x, F_x), bias (F_x,)
    w_x = jax.random.normal(kwx, (F_x, F_x), dtype=jnp.float32) * 0.1
    b_x = jax.random.normal(kbx, (F_x,), dtype=jnp.float32) * 0.1
    # nn.Linear(F_g, F_x): weight (F_x, F_g), bias (F_x,)
    w_g = jax.random.normal(kwg, (F_x, F_g), dtype=jnp.float32) * 0.1
    b_g = jax.random.normal(kbg, (F_x,), dtype=jnp.float32) * 0.1
    return g, x, w_x, b_x, w_g, b_g


if __name__ == "__main__":
    key = jax.random.PRNGKey(0)
    k1, k2 = jax.random.split(key)

    # Case 1: aligned shapes (B*C and H*W multiples of 8 / 128).
    args1 = _make_case(k1, B=2, F_g=8, F_x=8, H=16, W=16)
    ref1 = cca_reference(*args1)

    out1 = jax.block_until_ready(cca_forward(*args1))
    assert out1.shape == ref1.shape
    assert jnp.allclose(out1, ref1, atol=1e-5, rtol=1e-5), "mismatch (aligned)"

    # Same case with small tile caps -> multi-block (2,2) grid, same code path.
    out1_tiled = jax.block_until_ready(
        cca_forward(*args1, max_block_rows=8, max_block_lanes=128))
    assert jnp.allclose(out1_tiled, ref1, atol=1e-5, rtol=1e-5), "tiled mismatch"

    # Case 2: non-aligned shapes (B*C=10, H*W=135) -> exercises cdiv grid with
    # Pallas-masked edge blocks instead of the old full-dim fallback.
    args2 = _make_case(k2, B=2, F_g=6, F_x=5, H=15, W=9)
    ref2 = cca_reference(*args2)
    out2 = jax.block_until_ready(cca_forward(*args2))
    assert out2.shape == ref2.shape
    assert jnp.allclose(out2, ref2, atol=1e-5, rtol=1e-5), "mismatch (unaligned)"

    print("KERNEL_OK")
</pallas_src>

<mosaic_0001>
module attributes {stable_mosaic.version = 11 : i64} {
  func.func @_apply_gate_kernel(%arg0: i32, %arg1: i32, %arg2: memref<16x128xf32, #tpu.memory_space<vmem>>, %arg3: memref<16x1xf32, #tpu.memory_space<vmem>>, %arg4: memref<16x128xf32, #tpu.memory_space<vmem>>) attributes {dimension_semantics = [#tpu.dimension_semantics<parallel>, #tpu.dimension_semantics<parallel>], iteration_bounds = array<i64: 1, 2>, scalar_prefetch = 0 : i64, scratch_operands = 0 : i64, tpu.core_type = #tpu.core_type<tc>, window_params = [{transform_indices = @transform_0, window_bounds = array<i64: 16, 128>}, {transform_indices = @transform_1, window_bounds = array<i64: 16, 1>}, {transform_indices = @transform_2, window_bounds = array<i64: 16, 128>}]} {
    %c0 = arith.constant 0 : index
    %c0_0 = arith.constant 0 : index
    %0 = vector.load %arg2[%c0, %c0_0] : memref<16x128xf32, #tpu.memory_space<vmem>>, vector<16x128xf32>
    %c0_1 = arith.constant 0 : index
    %c0_2 = arith.constant 0 : index
    %1 = vector.load %arg3[%c0_1, %c0_2] : memref<16x1xf32, #tpu.memory_space<vmem>>, vector<16x1xf32>
    %2 = vector.broadcast %1 : vector<16x1xf32> to vector<16x128xf32>
    %3 = arith.mulf %0, %2 : vector<16x128xf32>
    %cst = arith.constant 0.000000e+00 : f32
    %4 = vector.broadcast %cst : f32 to vector<16x128xf32>
    %5 = arith.maximumf %3, %4 : vector<16x128xf32>
    %c0_3 = arith.constant 0 : index
    %c0_4 = arith.constant 0 : index
    %6 = vector.load %arg4[%c0_3, %c0_4] : memref<16x128xf32, #tpu.memory_space<vmem>>, vector<16x128xf32>
    tpu.vector_store %arg4[%c0_3, %c0_4], %5 {strides = array<i32>} : memref<16x128xf32, #tpu.memory_space<vmem>>, vector<16x128xf32>,
    return
  }
  func.func @transform_0(%arg0: i32, %arg1: i32) -> (i32, i32) {
    %c0_i32 = arith.constant 0 : i32
    return %arg0, %arg1 : i32, i32
  }
  func.func @transform_1(%arg0: i32, %arg1: i32) -> (i32, i32) {
    %c0_i32 = arith.constant 0 : i32
    %c0_i32_0 = arith.constant 0 : i32
    return %arg0, %c0_i32 : i32, i32
  }
  func.func @transform_2(%arg0: i32, %arg1: i32) -> (i32, i32) {
    %c0_i32 = arith.constant 0 : i32
    return %arg0, %arg1 : i32, i32
  }
}

</mosaic_0001>

<bundles_post_ra>
// kernel: tpu_custom_call.1
= control target key start
LH: loop header
LB: loop body
LE: loop exit
PB: predicated region body
PF: predicated region fallthrough
CT: control target
= control target key end

     0   :  { %7 = vsyncpa [#allocation3], 0  ;;  %s708_s0 = inlined_call_operand.hbm [shape: f32[16,256], index: 0, kind: input, shape index: {}]   ;;  %s709_s1 = inlined_call_operand.vmem [shape: f32[16,1], index: 1, kind: input, shape index: {}]   ;;  %s710_s2 = inlined_call_operand.hbm [shape: f32[16,256], index: 2, kind: output, shape index: {}]  }
   0x1   :  { %9 = vsyncpa [#allocation3 + $0x1], 0 }
   0x2   :  { %10 = vsyncpa [#allocation4], 0 }
   0x3   :  { %12 = vsyncpa [#allocation4 + $0x1], 0  ;;  %s558_s9 = smov 0   ;;  %s560_s10 = smov 0  }
   0x4   :  { %s562_s11 = smov 0   ;;  %s564_s12 = smov 0  }
   0x5   :  { %s566_s13 = smov 0   ;;  %s568_s14 = smov 0  }
   0x6 LB: > { %s340_s15 = sadd.s32 4294967295, %s532_s14   ;;  %s341_s16 = sadd.s32 4294967294, %s532_s14   ;;  %s532_s14 = sphi %s568_s14, %s18_s14   ;;  %s528_s13 = sphi %s566_s13, %s721_s13   ;;  %s524_s12 = sphi %s564_s12, %s720_s12   ;;  %s520_s11 = sphi %s562_s11, %s719_s11   ;;  %s516_s10 = sphi %s560_s10, %s718_s10   ;;  %s512_s9 = sphi %s558_s9, %s717_s9  }
   0x7   : > { %s27_s17 = sadd.s32 1, %s528_s13  ;;  %s39_s18 = sadd.s32 1, %s520_s11 }
   0x8   : > { %p28_p0 = scmp.ge.s32.totalorder %s27_s17, 2  ;;  %p46_p1 = scmp.ne.s32.totalorder %s520_s11, %s516_s10 }
   0x9   : > { %p47_p2 = scmp.eq.s32.totalorder %s532_s14, 0  ;;  %p52_p3 = scmp.ne.s32.totalorder %s516_s10, %s512_s9 }
   0xa   : > { %s723_s17 = smov (%p28_p0, %s27_s17), 0  ;;  %p53_p5 = scmp.eq.s32.totalorder %s340_s15, 0 }
   0xb   : > { %p599_p4 = por %p47_p2, %p46_p1  ;;  %s35_s20 = ssub.s32 %s528_s13, %s723_s17 }
   0xc   : > { %p104_p6 = scmp.eq.s32.totalorder %s340_s15, 1  ;;  %p37_p7 = scmp.eq.s32.totalorder %s35_s20, 0 }
   0xd   : > { %p605_p8 = por %p53_p5, %p52_p3  ;;  %p110_p10 = scmp.eq.s32.totalorder %s341_s16, 1 }
   0xe   : > { %p609_p9 = por %p104_p6, %p46_p1  ;;  %p366_p13 = scmp.lt.s32.totalorder %s532_s14, 2 }
   0xf   : > { %s614_s23 = scalar_select %p37_p7, %s520_s11, %s39_s18  }
  0x10   : > { %p616_p11 = por %p110_p10, %p52_p3  ;;  %s139_s25 = sand.u32 1, %s520_s11  }
  0x11   : > { %s345_s26 = sshll.u32 %s139_s25, 4  ;;  %s346_s27 = sshll.u32 %s528_s13, 7 }
  0x12   : > { %s151_s30 = scalar_lea.hbm %s708_s0, %s346_s27  ;;  %s143_s3 = scalar_lea.vmem [#allocation2], %s345_s26 }
  0x13   : > { %s152_s4 = sshll.u32 %s143_s3, 4  ;;  %p629_p0 = pnand %p366_p13, %p599_p4  ;;  %s153_s4 = int_to_ptr.vmem [resolvable:$true] %s152_s4 }
  0x14   : > { %s140_s6 = scalar_lea.sflag [#allocation3], %s139_s25  ;;  %s437_s7 = scalar_lea.vmem %s153_s4, 256 }
  0x15   : > { %p426_p1 = pneg %p629_p0  ;;  %p438_p2 = scmp.ne.s32.totalorder %s153_s4, %s437_s7 }
  0x16   : > { %s534_s8 = smov [#allocation2]  }
  0x17   : > { %p440_p3 = pnand %p438_p2, %p426_p1  ;;  %s442_s15 = sshll.u32 %s534_s8, 4  ;;  %s443_s15 = int_to_ptr.vmem [resolvable:$false] %s442_s15 }
  0x18   : > { %s444_s16 = scalar_lea.vmem %s443_s15, 512  ;;  %p445_p6 = scmp.lt.s32.totalorder %s153_s4, %s443_s15 }
  0x19   : > { %p441_p5 = pneg %p440_p3  ;;  %p446_p7 = scmp.lt.s32.totalorder %s444_s16, %s437_s7 }
  0x1b   : > { %p447_p10 = por %p446_p7, %p445_p6 }
  0x1d   : > { %p448_p12 = pnand %p447_p10, %p441_p5 }
  0x1f   : > { %451 = shalt.err (!%p448_p12)
}
  0x20   : > { %s535_s18 = smov 256   ;;  %s536_s19 = smov 128  }
  0x21   : > { %s537_s20 = smov 8   ;;  %p347_p4 = scmp.ge.s32.totalorder %s532_s14, 1 }
  0x22   : > { %361 = dma.hbm_to_vmem [thread:$0]  (!%p629_p0), %s151_s30, 256, %s153_s4, %s140_s6, %s535_s18, %s536_s19, %s537_s20  }
  0x23   : > { %p160_p13 = scmp.lt.s32.totalorder %s532_s14, 3 }
  0x25   : > { %p161_p1 = pnand %p347_p4, %p160_p13 }
  0x26   : > { %s640_s25 = sand.u32 (!%p161_p1), 1, %s516_s10  }
  0x27   : > { %164 = sbr.rel (%p161_p1) target bundleno = 194 (0xc2), region = 28  ;;  %s348_s26 = sshll.u32 (!%p161_p1), %s640_s25, 4 }
  0x28   : > { %s167_s27 = scalar_lea.sflag (!%p161_p1), [#allocation3], %s640_s25  ;;  %s170_s28 = scalar_lea.vmem (!%p161_p1), [#allocation2], %s348_s26 }
  0x2c   : > { %503 = dma.done.wait (%p605_p8), %s167_s27, 256  }
  0x2d   : > { %505 = vsyncadd (%p605_p8), %s167_s27, 4294967040  ;;  %v538_v0 = vmov 0   ;;  %v206_v1 = vld [vmem:[%s709_s1] sm:$0xff]  ;;  %v207_v2 = vld [vmem:[%s709_s1 + $0x8] sm:$0xff]  ;;  %s195_s21 = scalar_lea.vmem [#allocation5], %s348_s26  ;;  %s351_s6 = sshll.u32 %s524_s12, 7 }
  0x2e   : > { %423 = vset.pattern.permute.xlu0 %v538_v0  ;;  %v204_v3 = vld [vmem:[%s170_s28] sm:$0xff]  ;;  %s240_s5 = sshll.u32 %s195_s21, 4  ;;  %v205_v6 = vld [vmem:[%s170_s28 + $0x8] sm:$0xff]  ;;  %s660_s15 = scalar_lea.hbm %s710_s2, %s351_s6  ;;  %s655_s5 = int_to_ptr.vmem [resolvable:$true] %s240_s5 }
  0x2f   : > { %210 = vperm.xlu0 %423, %v206_v1   ;;  %s225_s16 = scalar_lea.sflag [#allocation4], %s640_s25  ;;  %s452_s18 = scalar_lea.vmem %s655_s5, 256 }
  0x30   : > { %p453_p8 = scmp.ne.s32.totalorder %s655_s5, %s452_s18  ;;  %s539_s12 = smov [#allocation5]  }
  0x31   : > { %s456_s19 = sshll.u32 %s539_s12, 4  ;;  %s457_s19 = int_to_ptr.vmem [resolvable:$false] %s456_s19 }
  0x32   : > { %p454_p12 = pnand %p453_p8, %p609_p9  ;;  %s458_s20 = scalar_lea.vmem %s457_s19, 512 }
  0x33   : > { %215 = vperm.xlu0 %423, %v207_v2   ;;  %p459_p2 = scmp.lt.s32.totalorder %s655_s5, %s457_s19  ;;  %p460_p3 = scmp.lt.s32.totalorder %s458_s20, %s452_s18 }
  0x34   : > { %p455_p0 = pneg %p454_p12 }
  0x35   : > { %p461_p5 = por %p460_p3, %p459_p2 }
  0x37   : > { %p462_p6 = pnand %p461_p5, %p455_p0 }
  0xaa   : > { %v211_v4 = vpop.permute.xlu0 %210 }
  0xab   : > { %v218_v5 = vmul.f32 %v211_v4, %v204_v3 }
  0xad   : > { %v220_v7 = vmax.f32 %v218_v5, 0.0 }
  0xae   : > { %v216_v8 = vpop.permute.xlu0 %215 }
  0xaf   : > { %222 = vst [vmem:[%s195_s21] sm:$0xff] %v220_v7  ;;  %v219_v9 = vmul.f32 %v216_v8, %v205_v6 }
  0xb1   : > { %v221_v10 = vmax.f32 %v219_v9, 0.0 }
  0xb3   : > { %223 = vst [vmem:[%s195_s21 + $0x8] sm:$0xff] %v221_v10 }
  0xb4   : > { %465 = shalt.err (!%p462_p6)
}
  0xb5   : > { %s466_s26 = scalar_lea.hbm %s660_s15, 256  ;;  %s470_s29 = scalar_lea.hbm %s710_s2, 512 }
  0xb6   : > { %p467_p7 = scmp.ne.s32.totalorder %s660_s15, %s466_s26  ;;  %p471_p13 = scmp.lt.s32.totalorder %s660_s15, %s710_s2 }
  0xb7   : > { %p472_p1 = scmp.lt.s32.totalorder %s470_s29, %s466_s26 }
  0xb8   : > { %p468_p10 = pnand %p467_p7, %p609_p9 }
  0xb9   : > { %p473_p8 = por %p472_p1, %p471_p13 }
  0xba   : > { %p469_p4 = pneg %p468_p10 }
  0xbc   : > { %p474_p12 = pnand %p473_p8, %p469_p4 }
  0xbe   : > { %477 = shalt.err (!%p474_p12)
}
  0xbf   : > { %s540_s4 = smov 128   ;;  %s541_s21 = smov 256  }
  0xc0   : > { %s542_s6 = smov 8  }
  0xc1   : > { %356 = dma.vmem_to_hbm [thread:$0]  (%p609_p9), %s655_s5, 256, %s660_s15, %s225_s16, %s540_s4, %s541_s21, %s542_s6  }
  0xc2 PF: > { %s255_s7 = sand.u32 1, %s512_s9   ;;  %p716_p0 = scmp.ge.s32.totalorder %s532_s14, 2 }
  0xc3   : > { %s256_s8 = scalar_lea.sflag [#allocation4], %s255_s7 }
  0xc4   : > { %p363_p2 = pnand %p716_p0, %p616_p11 }
  0xc6   : > { %p364_p3 = pneg %p363_p2 }
  0xc8   : > { %507 = dma.done.wait (%p364_p3), %s256_s8, 256  }
  0xc9   : > { %509 = vsyncadd (%p364_p3), %s256_s8, 4294967040  ;;  %s18_s14 = sadd.s32 1, %s532_s14   ;;  %s717_s9 = smov %s516_s10 }
  0xca   : > { %p15_p5 = scmp.ge.s32.totalorder %s18_s14, 4   ;;  %s718_s10 = smov %s520_s11 }
  0xcb   : > { %s719_s11 = smov %s614_s23  ;;  %s720_s12 = smov %s528_s13 }
  0xcc   : > { %s721_s13 = smov %s723_s17  ;;  %17 = sbr.rel (!%p15_p5) target bundleno = 6 (0x6), region = 76 }
  0xd1   :  { %261 = vsyncpa [#allocation3], 1 }
  0xd2   :  { %263 = vsyncpa [#allocation3 + $0x1], 1 }
  0xd3   :  { %264 = vsyncpa [#allocation4], 1 }
  0xd4   :  { %266 = vsyncpa [#allocation4 + $0x1], 1 }

</bundles_post_ra>
